<compile_context>
chip_gen: v6e
topology: v6e:2x2x1
jax: 0.10.0
libtpu: 0.0.40
codegen_flags: <defaults>
</compile_context>

<pallas_src>
import jax
import jax.numpy as jnp
from jax.experimental import pallas as pl
from jax.experimental.pallas import tpu as pltpu

_EPS = 1e-5
_VMEM_LIMIT = 32 * 1024 * 1024


def _pick_band_rows(H):
  """Row-band height: a multiple of 8 dividing H if possible, else full H."""
  for th in (8, 16, 32):
    if H % th == 0:
      return th
  return H


# ---------------------------------------------------------------------------
# In-kernel helpers
# ---------------------------------------------------------------------------
def _load_halo_rows(ref, band, TH, H, NB, transform):
  """ref: (1, H, W, C) VMEM block.  Returns rows [r0-1 .. r0+TH] as a
  (TH+2, W, C) bf16 block with zero rows at the image boundary.  `transform`
  maps raw rows to the f32 values the conv consumes (identity for pass 1,
  BN1+ReLU for pass 2); boundary masking is applied after `transform`."""
  r0 = pl.multiple_of(band * TH, TH)
  top_start = jnp.maximum(r0 - 1, 0)
  bot_start = jnp.minimum(r0 + TH, H - 1)
  top = transform(ref[0, pl.ds(top_start, 1)]) * jnp.where(band == 0, 0.0, 1.0)
  mid = transform(ref[0, pl.ds(r0, TH)])
  bot = transform(ref[0, pl.ds(bot_start, 1)]) * jnp.where(band == NB - 1, 0.0, 1.0)
  return jnp.concatenate([top.astype(jnp.bfloat16),
                          mid.astype(jnp.bfloat16),
                          bot.astype(jnp.bfloat16)], axis=0)


def _band_conv3x3(xb, w_ref, TH, W):
  """xb: (TH+2, W, C) bf16 halo block; w_ref: (3, 3*C, CoutT) bf16.
  3x3 / pad=1 conv for one row band as 3 accumulated K=3*C matmuls over a
  single (TH+2, W, 3*C) bf16 column-tap matrix.  Returns (TH*W, CoutT) f32."""
  rows, _, C = xb.shape
  zcol = jnp.zeros((rows, 1, C), xb.dtype)
  cols = jnp.concatenate(
      [jnp.concatenate([zcol, xb[:, :-1, :]], axis=1),   # kw=0 -> x[w-1]
       xb,                                               # kw=1 -> x[w]
       jnp.concatenate([xb[:, 1:, :], zcol], axis=1)],   # kw=2 -> x[w+1]
      axis=-1)                                           # (TH+2, W, 3C) bf16
  acc = None
  for kh in range(3):
    lhs = cols[kh:kh + TH].reshape(TH * W, 3 * C)
    d = jnp.dot(lhs, w_ref[kh], preferred_element_type=jnp.float32)
    acc = d if acc is None else acc + d
  return acc


def _band_stats(y, count):
  """y: (rows, C) f32 -> (2, C) per-band [mean, centered sum of squares]."""
  mean = jnp.sum(y, axis=0, keepdims=True) / count
  m2 = jnp.sum(jnp.square(y - mean), axis=0, keepdims=True)
  return jnp.concatenate([mean, m2], axis=0)


# ---------------------------------------------------------------------------
# Kernels
# ---------------------------------------------------------------------------
def make_conv1_kernel(H, W, Cin, Cout, TH, NB, use_projection):
  """Pass 1: conv1 (3x3) [with the 1x1 projection fused into the same matmul],
  per-band BN partial [mean, M2]."""
  CoutT = 2 * Cout if use_projection else Cout

  def kernel(x_ref, w_ref, *out_refs):
    band = pl.program_id(1)
    xb = _load_halo_rows(x_ref, band, TH, H, NB,
                         lambda v: v.astype(jnp.float32))
    y = _band_conv3x3(xb, w_ref, TH, W)                        # (TH*W, CoutT) f32
    stats = _band_stats(y, TH * W).reshape(1, 1, 2, CoutT)
    if use_projection:
      y1_ref, sc_ref, s_ref = out_refs
      y1_ref[...] = y[:, :Cout].reshape(1, TH, W, Cout).astype(jnp.bfloat16)
      sc_ref[...] = y[:, Cout:].reshape(1, TH, W, Cout).astype(jnp.bfloat16)
    else:
      y1_ref, s_ref = out_refs
      y1_ref[...] = y.reshape(1, TH, W, Cout).astype(jnp.bfloat16)
    s_ref[...] = stats

  return kernel


def make_conv2_kernel(H, W, Cout, TH, NB):
  """Pass 2: BN1+ReLU applied pointwise at read, conv2 (3x3), BN2 partials."""

  def kernel(y1_ref, w_ref, a1_ref, b1_ref, y2_ref, s_ref):
    band = pl.program_id(1)
    a1 = a1_ref[...].reshape(1, 1, Cout)
    b1 = b1_ref[...].reshape(1, 1, Cout)

    def bn1_relu(v):                                            # bf16 rows -> f32
      return jnp.maximum(v.astype(jnp.float32) * a1 + b1, 0.0)

    ob = _load_halo_rows(y1_ref, band, TH, H, NB, bn1_relu)
    y = _band_conv3x3(ob, w_ref, TH, W)                         # (TH*W, Cout) f32
    s_ref[...] = _band_stats(y, TH * W).reshape(1, 1, 2, Cout)
    y2_ref[...] = y.reshape(1, TH, W, Cout).astype(jnp.bfloat16)

  return kernel


def make_output_kernel(use_projection):
  """Pass 3: out = relu(BN2(y2) + shortcut), lane-dense flat elementwise."""
  if use_projection:
    def kernel(y2_ref, sc_ref, a2_ref, b2_ref, as_ref, bs_ref, o_ref):
      y2 = y2_ref[...].astype(jnp.float32)
      sc = sc_ref[...].astype(jnp.float32)
      out = y2 * a2_ref[...] + b2_ref[...] + sc * as_ref[...] + bs_ref[...]
      o_ref[...] = jnp.maximum(out, 0.0).astype(o_ref.dtype)
  else:
    def kernel(y2_ref, x_ref, a2_ref, b2_ref, o_ref):
      y2 = y2_ref[...].astype(jnp.float32)
      xs = x_ref[...].astype(jnp.float32)
      out = y2 * a2_ref[...] + b2_ref[...] + xs
      o_ref[...] = jnp.maximum(out, 0.0).astype(o_ref.dtype)
  return kernel


# ---------------------------------------------------------------------------
# Wrapper
# ---------------------------------------------------------------------------
def _combine_stats(stats, count_band, total):
  """stats: (N, NB, 2, C) per-band [mean, M2] -> global (mean, biased var)."""
  C = stats.shape[-1]
  means = stats[..., 0, :].reshape(-1, C)
  m2s = stats[..., 1, :].reshape(-1, C)
  mean = jnp.mean(means, axis=0)                       # equal per-band counts
  m2 = jnp.sum(m2s, axis=0) + count_band * jnp.sum(jnp.square(means - mean), axis=0)
  return mean, m2 / total


def _bn_affine(mean, var, gamma, beta, eps):
  scale = gamma * jax.lax.rsqrt(var + eps)
  bias = beta - mean * scale
  return scale.astype(jnp.float32), bias.astype(jnp.float32)


def basic_block_nhwc(x_nhwc, params, in_channels, out_channels, stride=1, eps=_EPS):
  """NHWC BasicBlock forward (training-mode batch-stat BatchNorm)."""
  # TODO(synk): stride != 1 is not implemented in the Pallas kernels.
  assert stride == 1, "only stride=1 is implemented"
  N, H, W, Cin = x_nhwc.shape
  assert Cin == in_channels
  Cout = out_channels
  use_projection = (stride != 1) or (in_channels != out_channels)

  TH = _pick_band_rows(H)
  NB = H // TH
  count_band = TH * W
  total = N * NB * count_band                          # == N*H*W
  f32, bf16 = jnp.float32, jnp.bfloat16

  # Conv weights -> (kh, kw*Cin, Cout) layout, bf16.  The 1x1 projection conv
  # is fused into conv1 as Cout extra output columns whose only nonzero K-rows
  # are the centre tap (kh=1, kw=1).
  w1k = jnp.transpose(params["w1"], (2, 3, 1, 0)).reshape(3, 3 * Cin, Cout)
  CoutT = Cout
  if use_projection:
    ws = params["ws"].reshape(Cout, Cin).T                       # (Cin, Cout)
    proj = jnp.zeros((3, 3 * Cin, Cout), f32).at[1, Cin:2 * Cin, :].set(ws)
    w1k = jnp.concatenate([w1k, proj], axis=-1)
    CoutT = 2 * Cout
  w1k = w1k.astype(bf16)
  w2k = jnp.transpose(params["w2"], (2, 3, 1, 0)).reshape(3, 3 * Cout, Cout)
  w2k = w2k.astype(bf16)

  def const_spec(shape):
    nd = len(shape)
    # TODO(synk): pipeline_mode=pl.Buffered(1) would single-buffer these.
    return pl.BlockSpec(shape, lambda n, b, nd=nd: (0,) * nd)

  cparams = pltpu.CompilerParams(
      dimension_semantics=("parallel", "parallel"),
      vmem_limit_bytes=_VMEM_LIMIT)

  img_in = pl.BlockSpec((1, H, W, Cin), lambda n, b: (n, 0, 0, 0))
  y1_in = pl.BlockSpec((1, H, W, Cout), lambda n, b: (n, 0, 0, 0))
  band_out = pl.BlockSpec((1, TH, W, Cout), lambda n, b: (n, b, 0, 0))

  def stat_spec(C):
    return pl.BlockSpec((1, 1, 2, C), lambda n, b: (n, b, 0, 0))

  # ---- Pass 1: conv1 (+ fused 1x1 projection) + per-band BN partials -------
  if use_projection:
    y1, sc, s1 = pl.pallas_call(
        make_conv1_kernel(H, W, Cin, Cout, TH, NB, True),
        grid=(N, NB),
        in_specs=[img_in, const_spec(w1k.shape)],
        out_specs=(band_out, band_out, stat_spec(CoutT)),
        out_shape=(jax.ShapeDtypeStruct((N, H, W, Cout), bf16),
                   jax.ShapeDtypeStruct((N, H, W, Cout), bf16),
                   jax.ShapeDtypeStruct((N, NB, 2, CoutT), f32)),
        compiler_params=cparams,
    )(x_nhwc, w1k)
  else:
    y1, s1 = pl.pallas_call(
        make_conv1_kernel(H, W, Cin, Cout, TH, NB, False),
        grid=(N, NB),
        in_specs=[img_in, const_spec(w1k.shape)],
        out_specs=(band_out, stat_spec(Cout)),
        out_shape=(jax.ShapeDtypeStruct((N, H, W, Cout), bf16),
                   jax.ShapeDtypeStruct((N, NB, 2, Cout), f32)),
        compiler_params=cparams,
    )(x_nhwc, w1k)

  a1, b1 = _bn_affine(*_combine_stats(s1[..., :Cout], count_band, total),
                      params["g1"], params["b1"], eps)

  # ---- Pass 2: BN1+ReLU fused at read -> conv2 + per-band BN2 partials -----
  y2, s2 = pl.pallas_call(
      make_conv2_kernel(H, W, Cout, TH, NB),
      grid=(N, NB),
      in_specs=[y1_in, const_spec(w2k.shape),
                const_spec((1, Cout)), const_spec((1, Cout))],
      out_specs=(band_out, stat_spec(Cout)),
      out_shape=(jax.ShapeDtypeStruct((N, H, W, Cout), bf16),
                 jax.ShapeDtypeStruct((N, NB, 2, Cout), f32)),
      compiler_params=cparams,
  )(y1, w2k, a1.reshape(1, Cout), b1.reshape(1, Cout))

  a2, b2 = _bn_affine(*_combine_stats(s2, count_band, total),
                      params["g2"], params["b2"], eps)

  # ---- Pass 3: BN2 + shortcut + ReLU, lane-dense (N, H, W*Cout) layout ------
  WC = W * Cout
  flat_band = pl.BlockSpec((1, TH, WC), lambda n, b: (n, b, 0))
  vec_spec = pl.BlockSpec((1, WC), lambda n, b: (0, 0))

  def tile_vec(v):            # (Cout,) per-channel -> (1, W*Cout) lane-dense
    return jnp.tile(v, W).reshape(1, WC).astype(f32)

  y2f = y2.reshape(N, H, WC)
  if use_projection:
    a_s, b_s = _bn_affine(*_combine_stats(s1[..., Cout:], count_band, total),
                          params["gs"], params["bs"], eps)
    out_flat = pl.pallas_call(
        make_output_kernel(True),
        grid=(N, NB),
        in_specs=[flat_band, flat_band, vec_spec, vec_spec, vec_spec, vec_spec],
        out_specs=flat_band,
        out_shape=jax.ShapeDtypeStruct((N, H, WC), x_nhwc.dtype),
        compiler_params=cparams,
    )(y2f, sc.reshape(N, H, WC),
      tile_vec(a2), tile_vec(b2), tile_vec(a_s), tile_vec(b_s))
  else:
    out_flat = pl.pallas_call(
        make_output_kernel(False),
        grid=(N, NB),
        in_specs=[flat_band, flat_band, vec_spec, vec_spec],
        out_specs=flat_band,
        out_shape=jax.ShapeDtypeStruct((N, H, WC), x_nhwc.dtype),
        compiler_params=cparams,
    )(y2f, x_nhwc.reshape(N, H, WC), tile_vec(a2), tile_vec(b2))

  return out_flat.reshape(N, H, W, Cout)


def basic_block(x_nchw, params, in_channels, out_channels, stride=1, eps=_EPS):
  """NCHW entry point for parity with the PyTorch module.
  TODO(synk): keep the surrounding model NHWC (use basic_block_nhwc) to drop
  these two full-activation transposes."""
  x = jnp.transpose(x_nchw, (0, 2, 3, 1))
  out = basic_block_nhwc(x, params, in_channels, out_channels, stride, eps)
  return jnp.transpose(out, (0, 3, 1, 2))


# ---------------------------------------------------------------------------
# Params + pure-JAX reference (bf16 MXU operands, like the kernel; the kernel
# additionally round-trips inter-pass activations through bf16 storage).
# ---------------------------------------------------------------------------
def init_basicblock_params(key, in_channels, out_channels):
  k1, k2, k3 = jax.random.split(key, 3)
  Cin, Cout = in_channels, out_channels
  return {
      "w1": jax.random.normal(k1, (Cout, Cin, 3, 3), jnp.float32) * 0.1,
      "w2": jax.random.normal(k2, (Cout, Cout, 3, 3), jnp.float32) * 0.1,
      "ws": jax.random.normal(k3, (Cout, Cin, 1, 1), jnp.float32) * 0.1,
      "g1": jnp.ones((Cout,), jnp.float32), "b1": jnp.zeros((Cout,), jnp.float32),
      "g2": jnp.ones((Cout,), jnp.float32), "b2": jnp.zeros((Cout,), jnp.float32),
      "gs": jnp.ones((Cout,), jnp.float32), "bs": jnp.zeros((Cout,), jnp.float32),
  }


def _conv_ref(x, w, padding):
  return jax.lax.conv_general_dilated(
      x.astype(jnp.bfloat16), w.astype(jnp.bfloat16),
      window_strides=(1, 1), padding=padding,
      dimension_numbers=("NCHW", "OIHW", "NCHW"),
      preferred_element_type=jnp.float32)


def _bn_ref(y, g, b, eps=_EPS):
  mean = jnp.mean(y, axis=(0, 2, 3), keepdims=True)
  var = jnp.mean(jnp.square(y - mean), axis=(0, 2, 3), keepdims=True)
  return ((y - mean) * jax.lax.rsqrt(var + eps) * g.reshape(1, -1, 1, 1)
          + b.reshape(1, -1, 1, 1))


def basic_block_ref(x, params, in_channels, out_channels, stride=1):
  use_projection = (stride != 1) or (in_channels != out_channels)
  o = _conv_ref(x, params["w1"], ((1, 1), (1, 1)))
  o = jax.nn.relu(_bn_ref(o, params["g1"], params["b1"]))
  o = _conv_ref(o, params["w2"], ((1, 1), (1, 1)))
  o = _bn_ref(o, params["g2"], params["b2"])
  if use_projection:
    s = _conv_ref(x, params["ws"], ((0, 0), (0, 0)))
    s = _bn_ref(s, params["gs"], params["bs"])
  else:
    s = x
  return jax.nn.relu(o + s)


if __name__ == "__main__":
  key = jax.random.PRNGKey(0)
  kx, kp = jax.random.split(key)

  # Config 1: Cin != Cout -> projection (1x1 conv + BN) shortcut.
  N, Cin, Cout, H, W = 2, 4, 8, 16, 16
  x = jax.random.normal(kx, (N, Cin, H, W), jnp.float32)
  params = init_basicblock_params(kp, Cin, Cout)
  out = jax.block_until_ready(basic_block(x, params, Cin, Cout, stride=1))
  assert out.shape == (N, Cout, H, W)
  ref = jax.block_until_ready(basic_block_ref(x, params, Cin, Cout, stride=1))
  err = float(jnp.max(jnp.abs(out - ref)))
  assert err < 1e-1, f"projection-shortcut path mismatch: max abs err {err}"

  # Config 2: Cin == Cout -> identity shortcut.
  x2 = jax.random.normal(kx, (N, Cout, H, W), jnp.float32)
  params2 = init_basicblock_params(kp, Cout, Cout)
  out2 = jax.block_until_ready(basic_block(x2, params2, Cout, Cout, stride=1))
  assert out2.shape == (N, Cout, H, W)
  ref2 = jax.block_until_ready(basic_block_ref(x2, params2, Cout, Cout, stride=1))
  err2 = float(jnp.max(jnp.abs(out2 - ref2)))
  assert err2 < 1e-1, f"identity-shortcut path mismatch: max abs err {err2}"

  print("KERNEL_OK")
</pallas_src>

<mosaic_0001>
module attributes {stable_mosaic.version = 11 : i64} {
  func.func @kernel(%arg0: i32, %arg1: i32, %arg2: memref<1x16x16x4xf32, #tpu.memory_space<vmem>>, %arg3: memref<3x12x16xbf16, #tpu.memory_space<vmem>>, %arg4: memref<1x8x16x8xbf16, #tpu.memory_space<vmem>>, %arg5: memref<1x8x16x8xbf16, #tpu.memory_space<vmem>>, %arg6: memref<1x1x2x16xf32, #tpu.memory_space<vmem>>) attributes {dimension_semantics = [#tpu.dimension_semantics<parallel>, #tpu.dimension_semantics<parallel>], iteration_bounds = array<i64: 2, 2>, scalar_prefetch = 0 : i64, scratch_operands = 0 : i64, tpu.core_type = #tpu.core_type<tc>, window_params = [{transform_indices = @transform_0, window_bounds = array<i64: 1, 16, 16, 4>}, {pipeline_mode = #tpu.pipeline_mode<synchronous>, transform_indices = @transform_1, window_bounds = array<i64: 3, 12, 16>}, {transform_indices = @transform_2, window_bounds = array<i64: 1, 8, 16, 8>}, {transform_indices = @transform_3, window_bounds = array<i64: 1, 8, 16, 8>}, {transform_indices = @transform_4, window_bounds = array<i64: 1, 1, 2, 16>}]} {
    %c8_i32 = arith.constant 8 : i32
    %0 = arith.muli %arg1, %c8_i32 : i32
    %1 = tpu.assume_multiple %0, 8 : i32
    %c1_i32 = arith.constant 1 : i32
    %2 = arith.subi %1, %c1_i32 : i32
    %c0_i32 = arith.constant 0 : i32
    %3 = arith.maxsi %2, %c0_i32 : i32
    %c8_i32_0 = arith.constant 8 : i32
    %4 = arith.addi %1, %c8_i32_0 : i32
    %c15_i32 = arith.constant 15 : i32
    %5 = arith.minsi %4, %c15_i32 : i32
    %c0 = arith.constant 0 : index
    %6 = arith.index_cast %3 : i32 to index
    %c0_1 = arith.constant 0 : index
    %c0_2 = arith.constant 0 : index
    %7 = vector.load %arg2[%c0, %6, %c0_1, %c0_2] : memref<1x16x16x4xf32, #tpu.memory_space<vmem>>, vector<1x1x16x4xf32>
    %8 = vector.shape_cast %7 : vector<1x1x16x4xf32> to vector<1x16x4xf32>
    %c0_i32_3 = arith.constant 0 : i32
    %9 = arith.cmpi eq, %arg1, %c0_i32_3 : i32
    %cst = arith.constant 0.000000e+00 : f32
    %cst_4 = arith.constant 1.000000e+00 : f32
    %10 = arith.select %9, %cst, %cst_4 : f32
    %11 = vector.broadcast %10 : f32 to vector<1x16x4xf32>
    %12 = arith.mulf %8, %11 : vector<1x16x4xf32>
    %c0_5 = arith.constant 0 : index
    %13 = arith.index_cast %1 : i32 to index
    %c0_6 = arith.constant 0 : index
    %c0_7 = arith.constant 0 : index
    %14 = vector.load %arg2[%c0_5, %13, %c0_6, %c0_7] : memref<1x16x16x4xf32, #tpu.memory_space<vmem>>, vector<1x8x16x4xf32>
    %15 = vector.shape_cast %14 : vector<1x8x16x4xf32> to vector<8x16x4xf32>
    %c0_8 = arith.constant 0 : index
    %16 = arith.index_cast %5 : i32 to index
    %c0_9 = arith.constant 0 : index
    %c0_10 = arith.constant 0 : index
    %17 = vector.load %arg2[%c0_8, %16, %c0_9, %c0_10] : memref<1x16x16x4xf32, #tpu.memory_space<vmem>>, vector<1x1x16x4xf32>
    %18 = vector.shape_cast %17 : vector<1x1x16x4xf32> to vector<1x16x4xf32>
    %c1_i32_11 = arith.constant 1 : i32
    %19 = arith.cmpi eq, %arg1, %c1_i32_11 : i32
    %cst_12 = arith.constant 0.000000e+00 : f32
    %cst_13 = arith.constant 1.000000e+00 : f32
    %20 = arith.select %19, %cst_12, %cst_13 : f32
    %21 = vector.broadcast %20 : f32 to vector<1x16x4xf32>
    %22 = arith.mulf %18, %21 : vector<1x16x4xf32>
    %23 = arith.truncf %12 : vector<1x16x4xf32> to vector<1x16x4xbf16>
    %24 = arith.truncf %15 : vector<8x16x4xf32> to vector<8x16x4xbf16>
    %25 = arith.truncf %22 : vector<1x16x4xf32> to vector<1x16x4xbf16>
    %26 = tpu.concatenate %23, %24, %25 in 0 : vector<1x16x4xbf16>, vector<8x16x4xbf16>, vector<1x16x4xbf16> -> vector<10x16x4xbf16>
    %cst_14 = arith.constant 0.000000e+00 : bf16
    %27 = vector.broadcast %cst_14 : bf16 to vector<10x1x4xbf16>
    %28 = vector.extract_strided_slice %26 {offsets = [0, 0, 0], sizes = [10, 15, 4], strides = [1, 1, 1]} : vector<10x16x4xbf16> to vector<10x15x4xbf16>
    %29 = tpu.concatenate %27, %28 in 1 : vector<10x1x4xbf16>, vector<10x15x4xbf16> -> vector<10x16x4xbf16>
    %30 = vector.extract_strided_slice %26 {offsets = [0, 1, 0], sizes = [10, 15, 4], strides = [1, 1, 1]} : vector<10x16x4xbf16> to vector<10x15x4xbf16>
    %31 = tpu.concatenate %30, %27 in 1 : vector<10x15x4xbf16>, vector<10x1x4xbf16> -> vector<10x16x4xbf16>
    %32 = tpu.concatenate %29, %26, %31 in 2 : vector<10x16x4xbf16>, vector<10x16x4xbf16>, vector<10x16x4xbf16> -> vector<10x16x12xbf16>
    %33 = vector.extract_strided_slice %32 {offsets = [0, 0, 0], sizes = [8, 16, 12], strides = [1, 1, 1]} : vector<10x16x12xbf16> to vector<8x16x12xbf16>
    %34 = vector.shape_cast %33 : vector<8x16x12xbf16> to vector<128x12xbf16>
    %c0_15 = arith.constant 0 : index
    %c0_16 = arith.constant 0 : index
    %c0_17 = arith.constant 0 : index
    %35 = vector.load %arg3[%c0_15, %c0_16, %c0_17] : memref<3x12x16xbf16, #tpu.memory_space<vmem>>, vector<1x12x16xbf16>
    %36 = vector.shape_cast %35 : vector<1x12x16xbf16> to vector<12x16xbf16>
    %cst_18 = arith.constant dense<0.000000e+00> : vector<128x16xf32>
    %37 = tpu.matmul %34, %36, %cst_18 {dimension_numbers = #tpu.dot_dimension_numbers<[1], [0], [0], [1], [0, 0, 1, 1], [], []>} : vector<128x12xbf16>, vector<12x16xbf16>, vector<128x16xf32> -> vector<128x16xf32>
    %38 = vector.extract_strided_slice %32 {offsets = [1, 0, 0], sizes = [8, 16, 12], strides = [1, 1, 1]} : vector<10x16x12xbf16> to vector<8x16x12xbf16>
    %39 = vector.shape_cast %38 : vector<8x16x12xbf16> to vector<128x12xbf16>
    %c1 = arith.constant 1 : index
    %c0_19 = arith.constant 0 : index
    %c0_20 = arith.constant 0 : index
    %40 = vector.load %arg3[%c1, %c0_19, %c0_20] : memref<3x12x16xbf16, #tpu.memory_space<vmem>>, vector<1x12x16xbf16>
    %41 = vector.shape_cast %40 : vector<1x12x16xbf16> to vector<12x16xbf16>
    %cst_21 = arith.constant dense<0.000000e+00> : vector<128x16xf32>
    %42 = tpu.matmul %39, %41, %cst_21 {dimension_numbers = #tpu.dot_dimension_numbers<[1], [0], [0], [1], [0, 0, 1, 1], [], []>} : vector<128x12xbf16>, vector<12x16xbf16>, vector<128x16xf32> -> vector<128x16xf32>
    %43 = arith.addf %37, %42 : vector<128x16xf32>
    %44 = vector.extract_strided_slice %32 {offsets = [2, 0, 0], sizes = [8, 16, 12], strides = [1, 1, 1]} : vector<10x16x12xbf16> to vector<8x16x12xbf16>
    %45 = vector.shape_cast %44 : vector<8x16x12xbf16> to vector<128x12xbf16>
    %c2 = arith.constant 2 : index
    %c0_22 = arith.constant 0 : index
    %c0_23 = arith.constant 0 : index
    %46 = vector.load %arg3[%c2, %c0_22, %c0_23] : memref<3x12x16xbf16, #tpu.memory_space<vmem>>, vector<1x12x16xbf16>
    %47 = vector.shape_cast %46 : vector<1x12x16xbf16> to vector<12x16xbf16>
    %cst_24 = arith.constant dense<0.000000e+00> : vector<128x16xf32>
    %48 = tpu.matmul %45, %47, %cst_24 {dimension_numbers = #tpu.dot_dimension_numbers<[1], [0], [0], [1], [0, 0, 1, 1], [], []>} : vector<128x12xbf16>, vector<12x16xbf16>, vector<128x16xf32> -> vector<128x16xf32>
    %49 = arith.addf %43, %48 : vector<128x16xf32>
    %cst_25 = arith.constant dense<0.000000e+00> : vector<16xf32>
    %50 = vector.multi_reduction <add>, %49, %cst_25 [0] : vector<128x16xf32> to vector<16xf32>
    %51 = vector.shape_cast %50 : vector<16xf32> to vector<1x16xf32>
    %cst_26 = arith.constant 1.280000e+02 : f32
    %52 = vector.broadcast %cst_26 : f32 to vector<1x16xf32>
    %53 = arith.divf %51, %52 : vector<1x16xf32>
    %54 = vector.broadcast %53 : vector<1x16xf32> to vector<128x16xf32>
    %55 = arith.subf %49, %54 : vector<128x16xf32>
    %56 = arith.mulf %55, %55 : vector<128x16xf32>
    %cst_27 = arith.constant dense<0.000000e+00> : vector<16xf32>
    %57 = vector.multi_reduction <add>, %56, %cst_27 [0] : vector<128x16xf32> to vector<16xf32>
    %58 = vector.shape_cast %57 : vector<16xf32> to vector<1x16xf32>
    %59 = tpu.concatenate %53, %58 in 0 : vector<1x16xf32>, vector<1x16xf32> -> vector<2x16xf32>
    %60 = vector.shape_cast %59 : vector<2x16xf32> to vector<1x1x2x16xf32>
    %61 = vector.extract_strided_slice %49 {offsets = [0, 0], sizes = [128, 8], strides = [1, 1]} : vector<128x16xf32> to vector<128x8xf32>
    %62 = vector.shape_cast %61 : vector<128x8xf32> to vector<1x8x16x8xf32>
    %63 = arith.truncf %62 : vector<1x8x16x8xf32> to vector<1x8x16x8xbf16>
    %c0_28 = arith.constant 0 : index
    %c0_29 = arith.constant 0 : index
    %c0_30 = arith.constant 0 : index
    %c0_31 = arith.constant 0 : index
    %64 = vector.load %arg4[%c0_28, %c0_29, %c0_30, %c0_31] : memref<1x8x16x8xbf16, #tpu.memory_space<vmem>>, vector<1x8x16x8xbf16>
    tpu.vector_store %arg4[%c0_28, %c0_29, %c0_30, %c0_31], %63 {strides = array<i32>} : memref<1x8x16x8xbf16, #tpu.memory_space<vmem>>, vector<1x8x16x8xbf16>,
    %65 = vector.extract_strided_slice %49 {offsets = [0, 8], sizes = [128, 8], strides = [1, 1]} : vector<128x16xf32> to vector<128x8xf32>
    %66 = vector.shape_cast %65 : vector<128x8xf32> to vector<1x8x16x8xf32>
    %67 = arith.truncf %66 : vector<1x8x16x8xf32> to vector<1x8x16x8xbf16>
    %c0_32 = arith.constant 0 : index
    %c0_33 = arith.constant 0 : index
    %c0_34 = arith.constant 0 : index
    %c0_35 = arith.constant 0 : index
    %68 = vector.load %arg5[%c0_32, %c0_33, %c0_34, %c0_35] : memref<1x8x16x8xbf16, #tpu.memory_space<vmem>>, vector<1x8x16x8xbf16>
    tpu.vector_store %arg5[%c0_32, %c0_33, %c0_34, %c0_35], %67 {strides = array<i32>} : memref<1x8x16x8xbf16, #tpu.memory_space<vmem>>, vector<1x8x16x8xbf16>,
    %c0_36 = arith.constant 0 : index
    %c0_37 = arith.constant 0 : index
    %c0_38 = arith.constant 0 : index
    %c0_39 = arith.constant 0 : index
    %69 = vector.load %arg6[%c0_36, %c0_37, %c0_38, %c0_39] : memref<1x1x2x16xf32, #tpu.memory_space<vmem>>, vector<1x1x2x16xf32>
    tpu.vector_store %arg6[%c0_36, %c0_37, %c0_38, %c0_39], %60 {strides = array<i32>} : memref<1x1x2x16xf32, #tpu.memory_space<vmem>>, vector<1x1x2x16xf32>,
    return
  }
  func.func @transform_0(%arg0: i32, %arg1: i32) -> (i32, i32, i32, i32) {
    %c0_i32 = arith.constant 0 : i32
    %c0_i32_0 = arith.constant 0 : i32
    %c0_i32_1 = arith.constant 0 : i32
    %c0_i32_2 = arith.constant 0 : i32
    return %arg0, %c0_i32, %c0_i32_0, %c0_i32_1 : i32, i32, i32, i32
  }
  func.func @transform_1(%arg0: i32, %arg1: i32) -> (i32, i32, i32) {
    %c0_i32 = arith.constant 0 : i32
    %c0_i32_0 = arith.constant 0 : i32
    %c0_i32_1 = arith.constant 0 : i32
    %c0_i32_2 = arith.constant 0 : i32
    return %c0_i32, %c0_i32_0, %c0_i32_1 : i32, i32, i32
  }
  func.func @transform_2(%arg0: i32, %arg1: i32) -> (i32, i32, i32, i32) {
    %c0_i32 = arith.constant 0 : i32
    %c0_i32_0 = arith.constant 0 : i32
    %c0_i32_1 = arith.constant 0 : i32
    return %arg0, %arg1, %c0_i32, %c0_i32_0 : i32, i32, i32, i32
  }
  func.func @transform_3(%arg0: i32, %arg1: i32) -> (i32, i32, i32, i32) {
    %c0_i32 = arith.constant 0 : i32
    %c0_i32_0 = arith.constant 0 : i32
    %c0_i32_1 = arith.constant 0 : i32
    return %arg0, %arg1, %c0_i32, %c0_i32_0 : i32, i32, i32, i32
  }
  func.func @transform_4(%arg0: i32, %arg1: i32) -> (i32, i32, i32, i32) {
    %c0_i32 = arith.constant 0 : i32
    %c0_i32_0 = arith.constant 0 : i32
    %c0_i32_1 = arith.constant 0 : i32
    return %arg0, %arg1, %c0_i32, %c0_i32_0 : i32, i32, i32, i32
  }
}

</mosaic_0001>

<bundles_post_ra>
// kernel: tpu_custom_call.1
= control target key start
LH: loop header
LB: loop body
LE: loop exit
PB: predicated region body
PF: predicated region fallthrough
CT: control target
= control target key end

     0   :  { %10 = vsyncpa [#allocation3], 0  ;;  %s2439_s0 = inlined_call_operand.vmem [shape: f32[2,16,16,4], index: 0, kind: input, shape index: {}]   ;;  %s2440_s1 = inlined_call_operand.vmem [shape: bf16[3,12,16], index: 1, kind: input, shape index: {}]   ;;  %s2441_s2 = inlined_call_operand.vmem [shape: bf16[2,16,16,8], index: 2, kind: output, shape index: {0}]   ;;  %s2442_s3 = inlined_call_operand.vmem [shape: bf16[2,16,16,8], index: 3, kind: output, shape index: {1}]   ;;  %s2443_s4 = inlined_call_operand.hbm [shape: f32[2,2,2,16], index: 4, kind: output, shape index: {2}]  }
   0x1   :  { %12 = vsyncpa [#allocation3 + $0x1], 0  ;;  %s1766_s15 = smov 0   ;;  %s1768_s16 = smov 0  }
   0x2   :  { %s1770_s17 = smov 0   ;;  %s1772_s18 = smov 0  }
   0x3   :  { %s1774_s19 = smov 0   ;;  %s1776_s20 = smov 0  }
   0x4   :  { %s1778_s21 = smov 0   ;;  %s1780_s22 = smov 0  }
   0x5 LB: > { %s1388_s23 = sadd.s32 4294967295, %s1735_s22   ;;  %s1389_s24 = sadd.s32 4294967294, %s1735_s22   ;;  %s1735_s22 = sphi %s1780_s22, %s18_s22   ;;  %s1731_s21 = sphi %s1778_s21, %s2457_s21   ;;  %s1727_s20 = sphi %s1776_s20, %s2456_s20   ;;  %s1723_s19 = sphi %s1774_s19, %s2455_s19   ;;  %s1719_s18 = sphi %s1772_s18, %s2454_s18   ;;  %s1715_s17 = sphi %s1770_s17, %s2453_s17   ;;  %s1711_s16 = sphi %s1768_s16, %s2452_s16   ;;  %s1707_s15 = sphi %s1766_s15, %s2451_s15  }
   0x6   : > { %s27_s25 = sadd.s32 1, %s1727_s20  ;;  %s30_s26 = sadd.s32 1, %s1731_s21 }
   0x7   : > { %p28_p0 = scmp.ge.s32.totalorder %s27_s25, 2  ;;  %p152_p1 = scmp.ne.s32.totalorder %s1715_s17, %s1711_s16 }
   0x8   : > { %p153_p2 = scmp.eq.s32.totalorder %s1388_s23, 3  ;;  %p158_p5 = scmp.ne.s32.totalorder %s1711_s16, %s1707_s15 }
   0x9   : > { %s2459_s25 = smov (%p28_p0, %s27_s25), 0  ;;  %s2461_s26 = smov (!%p28_p0, %s30_s26), %s1731_s21 }
   0xa   : > { %s138_s27 = ssub.s32 %s1727_s20, %s2459_s25  ;;  %p1817_p3 = por %p153_p2, %p152_p1 }
   0xb   : > { %p32_p4 = scmp.ge.s32.totalorder %s2461_s26, 2  ;;  %p159_p6 = scmp.eq.s32.totalorder %s1389_s24, 3 }
   0xc   : > { %p1392_p7 = scmp.ge.s32.totalorder %s1735_s22, 1  ;;  %p188_p9 = scmp.lt.s32.totalorder %s1735_s22, 5 }
   0xd   : > { %s2463_s26 = smov (%p32_p4, %s2461_s26), 0  ;;  %p1826_p8 = por %p159_p6, %p158_p5 }
   0xe   : > { %s137_s30 = ssub.s32 %s1731_s21, %s2463_s26  ;;  %s142_s5 = sadd.s32 1, %s1715_s17 }
   0xf   : > { %s139_s6 = sor.u32 %s138_s27, %s137_s30  ;;  %p189_p10 = pnand %p1392_p7, %p188_p9 }
  0x10   : > { %p140_p11 = scmp.eq.s32.totalorder %s139_s6, 0  ;;  %p234_p12 = scmp.lt.s32.totalorder (!%p189_p10), %s1723_s19, 1 }
  0x11   : > { %192 = sbr.rel (%p189_p10) target bundleno = 530 (0x212), region = 28  ;;  %s1462_s9 = sshll.u32 (!%p189_p10), %s1719_s18, 7 }
  0x12   : > { %s1835_s7 = scalar_select %p140_p11, %s1715_s17, %s142_s5  }
  0x13   : > { %s1843_s10 = sshll.u32 (!%p189_p10), %s1719_s18, 3  ;;  %p273_p1 = scmp.eq.s32.totalorder (!%p189_p10), %s1719_s18, 0 }
  0x14   : > { %s1405_s12 = sadd.s32 (!%p189_p10), 4294967295, %s1843_s10  ;;  %s266_s27 = sadd.s32 (!%p189_p10), 8, %s1843_s10 }
  0x15   : > { %p264_p13 = scmp.gt.s32.totalorder (!%p189_p10), %s1405_s12, 0  ;;  %p1880_p0 = scmp.lt.s32.totalorder (!%p189_p10), %s266_s27, 15 }
  0x16   : > { %s1839_s8 = scalar_select %p234_p12, %s1723_s19, 1  ;;  %v1640_v0 = vld [vmem:[%s2440_s1 + $0x8] sm:$0x3f]   ;;  %vm590_vm0 = vcmask 1045504   ;;  %vm439_vm1 = vsmask.f32 7424 }
  0x17   : > { %s2465_s12 = smov (!%p264_p13, %s1405_s12), 0  ;;  %1563 = vmatprep.subr.msk.bf16.mxu1 %vm590_vm0, %v1640_v0  ;;  %v592_v8 = vsel %vm590_vm0, %v1640_v0, 0  ;;  %1562 = vmatprep.subr.msk.bf16.mxu0 %vm590_vm0, %v1640_v0  ;;  %s2467_s27 = smov (!%p1880_p0, %s266_s27), 15  ;;  %vm438_vm2 = vcmask 1047552   ;;  %v1947_v41 = vld [vmem:[%s2440_s1] sm:$0x3f]  }
  0x18   : > { %s1461_s11 = sshll.u32 %s1839_s8, 8  ;;  %1561 = vmatpush3.bf16.msra.mxu1 %v592_v8  ;;  %1507 = vmatpush3.bf16.msra.mxu0 %v592_v8  ;;  %p300_p2 = scmp.eq.s32.totalorder %s1719_s18, 1  ;;  %vm1938_vm3 = vmand %vm438_vm2, %vm439_vm1  ;;  %v1642_v49 = vld [vmem:[%s2440_s1 + $0x10] sm:$0x3f]   ;;  %vm395_vm4 = vcmask 1040384   ;;  %vm511_vm7 = vcmask 31744  }
  0x19   : > { %s1850_s23 = scalar_lea.vmem %s2439_s0, %s1461_s11  ;;  %s1406_s11 = sshll.u32 %s2465_s12, 4  ;;  %1564 = vmatprep.subr.msk.bf16.mxu1 %vm590_vm0, %v1947_v41  ;;  %1565 = vmatprep.subr.msk.bf16.mxu0 %vm590_vm0, %v1642_v49  ;;  %vm396_vm5 = vsmask.f32 256  ;;  %vm542_vm8 = vcmask 64512   ;;  %vm573_vm9 = vcmask 97280   ;;  %vm1099_vm10 = vcmask 60416  }
  0x1a   : > { %s1853_s24 = scalar_lea.vmem %s1850_s23, %s1462_s9  ;;  %s1737_s9 = smov 4   ;;  %vm2038_vm6 = vmand %vm395_vm4, %vm396_vm5  ;;  %vm924_vm11 = vcmask 130048   ;;  %vm1180_vm12 = vcmask 123904  }
  0x1b   : > { %v288_v1 = vld [vmem:[%s1853_s24 + $0x40] sm:$0xff]  ;;  %v289_v2 = vld [vmem:[%s1853_s24 + $0x48] sm:$0xff]  ;;  %v290_v6 = vld [vmem:[%s1853_s24 + $0x50] sm:$0xff]  ;;  %s1924_s13 = scalar_select %p273_p1, 0.0, 1.0 }
  0x1c   : > { %v280_v3 = vld [vmem:[%s1853_s24] sm:$0xff]  ;;  %v1862_v4 = vpack.c.bf16 %v289_v2, %v288_v1  ;;  %v281_v5 = vld [vmem:[%s1853_s24 + $0x8] sm:$0xff]  ;;  %v291_v7 = vld [vmem:[%s1853_s24 + $0x58] sm:$0xff]  ;;  %s1408_s12 = sshll.u32 %s2467_s27, 4  ;;  %s270_s14 = scalar_lea.vmem %s1850_s23, %s1406_s11 }
  0x1d   : > { %v1872_v9 = vpack.c.bf16 %v281_v5, %v280_v3  ;;  %v1874_v10 = vpack.c.bf16 %v291_v7, %v290_v6  ;;  %v282_v11 = vld [vmem:[%s1853_s24 + $0x10] sm:$0xff]  ;;  %v283_v12 = vld [vmem:[%s1853_s24 + $0x18] sm:$0xff]  ;;  %v292_v15 = vld [vmem:[%s1853_s24 + $0x60] sm:$0xff]  ;;  %s297_s27 = scalar_lea.vmem %s1850_s23, %s1408_s12  ;;  %v275_v62 = vstv %s1924_s13  ;;  %s1738_s23 = smov 8  }
  0x1e   : > { %471 = vrot.lane.b32.xlu0 %v1862_v4, %s1737_s9  ;;  %v1886_v13 = vpack.c.bf16 %v283_v12, %v282_v11  ;;  %v354_v14 = vshll.u32 %v1862_v4, 16  ;;  %v293_v16 = vld [vmem:[%s1853_s24 + $0x68] sm:$0xff]  ;;  %v294_v19 = vld [vmem:[%s1853_s24 + $0x70] sm:$0xff]  ;;  %v295_v20 = vld [vmem:[%s1853_s24 + $0x78] sm:$0xff]  ;;  %v351_v21 = vshrl.u32 %v1862_v4, 16  ;;  %p242_p4 = scmp.lt.s32.totalorder %s1843_s10, 15 }
  0x1f   : > { %463 = vrot.lane.b32.xlu1 %v1872_v9, %s1737_s9  ;;  %v358_v17 = vshrl.u32 %v1874_v10, 16  ;;  %v361_v18 = vshll.u32 %v1874_v10, 16  ;;  %v323_v26 = vshrl.u32 %v1872_v9, 16  ;;  %v326_v27 = vshll.u32 %v1872_v9, 16  ;;  %v284_v30 = vld [vmem:[%s1853_s24 + $0x20] sm:$0xff]  ;;  %v285_v34 = vld [vmem:[%s1853_s24 + $0x28] sm:$0xff] }
  0x20   : > { %v418_v22 = vrot.slane %v354_v14, 1  ;;  %v330_v23 = vshrl.u32 %v1886_v13, 16  ;;  %v333_v24 = vshll.u32 %v1886_v13, 16  ;;  %v1917_v28 = vpack.c.bf16 %v293_v16, %v292_v15  ;;  %v286_v35 = vld [vmem:[%s1853_s24 + $0x30] sm:$0xff]  ;;  %v287_v36 = vld [vmem:[%s1853_s24 + $0x38] sm:$0xff]  ;;  %v271_v54 = vld [vmem:[%s270_s14] sm:$0xff] }
  0x21   : > { %v420_v25 = vrot.slane %v361_v18, 1  ;;  %v1928_v31 = vpack.c.bf16 %v295_v20, %v294_v19  ;;  %v410_v33 = vrot.slane %v326_v27, 1  ;;  %v360_v42 = vrot.slane %v358_v17, 7  ;;  %s1951_s24 = scalar_select %p300_p2, 0.0, 1.0  ;;  %v272_v59 = vld [vmem:[%s270_s14 + $0x8] sm:$0xff] }
  0x22   : > { %473 = vrot.lane.b32.xlu0 %v1874_v10, %s1737_s9  ;;  %v412_v29 = vrot.slane %v333_v24, 1  ;;  %v419_v38 = vor.u32 %v418_v22, %v351_v21  ;;  %v368_v40 = vshll.u32 %v1917_v28, 16  ;;  %v353_v43 = vrot.slane %v351_v21, 7  ;;  %v298_v63 = vld [vmem:[%s297_s27] sm:$0xff]  ;;  %v299_v0 = vld [vmem:[%s297_s27 + $0x8] sm:$0xff]  ;;  %s2469_s10 = smov (!%p242_p4, %s1843_s10), 15 }
  0x23   : > { %465 = vrot.lane.b32.xlu1 %v1886_v13, %s1737_s9  ;;  %v421_v32 = vor.u32 %v420_v25, %v358_v17  ;;  %v411_v44 = vor.u32 %v410_v33, %v323_v26  ;;  %v332_v45 = vrot.slane %v330_v23, 7  ;;  %v308_v46 = vpack.c.bf16 %v285_v34, %v284_v30  ;;  %s1398_s13 = sshll.u32 %s1839_s8, 5  ;;  %s1739_s5 = smov 120  }
  0x24   : > { %v413_v39 = vor.u32 %v412_v29, %v330_v23  ;;  %v365_v47 = vshrl.u32 %v1917_v28, 16  ;;  %v1956_v48 = vpack.c.bf16 %v287_v36, %v286_v35  ;;  %v325_v51 = vrot.slane %v323_v26, 7  ;;  %s1457_s27 = sshll.u32 %s1723_s19, 1 }
  0x25   : > { %v447_v50 = vsel %vm1938_vm3, %v421_v32, 0  ;;  %v422_v52 = vrot.slane %v368_v40, 1  ;;  %v375_v53 = vshll.u32 %v1928_v31, 16  ;;  %v446_v55 = vsel %vm1938_vm3, %v419_v38, 0  ;;  %s1222_s11 = sadd.s32 %s1719_s18, %s1457_s27  ;;  %s1740_s18 = smov [#allocation2]  }
  0x26   : > { %475 = vrot.lane.b32.xlu0 %v1917_v28, %s1737_s9  ;;  %v443_v56 = vsel %vm1938_vm3, %v413_v39, 0  ;;  %v367_v57 = vrot.slane %v365_v47, 7  ;;  %v372_v58 = vshrl.u32 %v1928_v31, 16  ;;  %v442_v60 = vsel %vm1938_vm3, %v411_v44, 0  ;;  %s1647_s27 = sshll.u32 %s1740_s18, 4  ;;  %s1648_s27 = int_to_ptr.vmem [resolvable:$false] %s1647_s27 }
  0x27   : > { %477 = vrot.lane.b32.xlu1 %v1928_v31, %s1737_s9  ;;  %v344_v61 = vshrl.u32 %v1956_v48, 16  ;;  %v302_v1 = vstv %s1951_s24  ;;  %v347_v3 = vshll.u32 %v1956_v48, 16  ;;  %v337_v5 = vshrl.u32 %v308_v46, 16  ;;  %s231_s24 = sand.u32 1, %s1711_s16  }
  0x28   : > { %v374_v2 = vrot.slane %v372_v58, 7  ;;  %v276_v6 = vmul.f32 %v275_v62, %v271_v54  ;;  %v423_v7 = vor.u32 %v422_v52, %v365_v47  ;;  %v424_v8 = vrot.slane %v375_v53, 1  ;;  %s1393_s6 = sshll.u32 %s231_s24, 1  ;;  %s1203_s19 = scalar_lea.sflag [#allocation3], %s231_s24 }
  0x29   : > { %v340_v11 = vshll.u32 %v308_v46, 16  ;;  %v277_v12 = vmul.f32 %v275_v62, %v272_v59  ;;  %v303_v15 = vmul.f32 %v302_v1, %v298_v63  ;;  %v304_v16 = vmul.f32 %v302_v1, %v299_v0 }
  0x2a   : > { %503 = vrot.lane.b32.xlu0 %v447_v50, %s1738_s23  ;;  %v1985_v17 = vor.u32 %v354_v14, %v353_v43  ;;  %v1989_v19 = vor.u32 %v326_v27, %v325_v51  ;;  %v363_v21 = vor.u32 %v361_v18, %v360_v42  ;;  %v346_v22 = vrot.slane %v344_v61, 7 }
  0x2b   : > { %501 = vrot.lane.b32.xlu1 %v446_v55, %s1738_s23  ;;  %v305_v20 = vpack.c.bf16 %v277_v12, %v276_v6  ;;  %v416_v23 = vrot.slane %v347_v3, 1  ;;  %v339_v25 = vrot.slane %v337_v5, 7  ;;  %v1996_v26 = vor.u32 %v333_v24, %v332_v45 }
  0x2c   : > { %v448_v4 = vsel %vm1938_vm3, %v423_v7, 0  ;;  %v425_v9 = vor.u32 %v424_v8, %v372_v58  ;;  %v414_v14 = vrot.slane %v340_v11, 1  ;;  %v314_v10 = vpack.c.bf16 %v304_v16, %v303_v15 }
  0x2d   : > { %v316_v27 = vshrl.u32 %v305_v20, 16  ;;  %v319_v28 = vshll.u32 %v305_v20, 16  ;;  %v2001_v18 = vor.u32 %v368_v40, %v367_v57  ;;  %v2003_v29 = vor.u32 %v375_v53, %v374_v2 }
  0x2e   : > { %493 = vrot.lane.b32.xlu0 %v442_v60, %s1738_s23  ;;  %v417_v13 = vor.u32 %v416_v23, %v344_v61  ;;  %v2006_v24 = vor.u32 %v340_v11, %v339_v25  ;;  %v449_v31 = vsel %vm1938_vm3, %v425_v9, 0  ;;  %v415_v32 = vor.u32 %v414_v14, %v337_v5 }
  0x2f   : > { %495 = vrot.lane.b32.xlu1 %v443_v56, %s1738_s23  ;;  %v318_v30 = vrot.slane %v316_v27, 7  ;;  %v699_v33 = vsel %vm590_vm0, %v1947_v41, 0  ;;  %v809_v34 = vsel %vm590_vm0, %v1642_v49, 0  ;;  %v408_v35 = vrot.slane %v319_v28, 1 }
  0x30   : > { %v382_v36 = vshll.u32 %v314_v10, 16  ;;  %v2014_v38 = vor.u32 %v347_v3, %v346_v22  ;;  %v444_v40 = vsel %vm1938_vm3, %v415_v32, 0  ;;  %v445_v42 = vsel %vm1938_vm3, %v417_v13, 0 }
  0x31   : > { %v2016_v39 = vor.u32 %v319_v28, %v318_v30  ;;  %v409_v41 = vor.u32 %v408_v35, %v316_v27  ;;  %v379_v43 = vshrl.u32 %v314_v10, 16  ;;  %v404_v55 = vsel %vm2038_vm6, 0, %v363_v21 }
  0x32   : > { %505 = vrot.lane.b32.xlu0 %v448_v4, %s1738_s23  ;;  %v426_v44 = vrot.slane %v382_v36, 1  ;;  %v403_v57 = vsel %vm2038_vm6, 0, %v1985_v17  ;;  %v399_v61 = vsel %vm2038_vm6, 0, %v1989_v19  ;;  %v400_v0 = vsel %vm2038_vm6, 0, %v1996_v26 }
  0x33   : > { %467 = vrot.lane.b32.xlu1 %v308_v46, %s1737_s9  ;;  %v441_v45 = vsel %vm1938_vm3, %v409_v41, 0  ;;  %v405_v6 = vsel %vm2038_vm6, 0, %v2001_v18  ;;  %v406_v16 = vsel %vm2038_vm6, 0, %v2003_v29  ;;  %v401_v22 = vsel %vm2038_vm6, 0, %v2006_v24 }
  0x34   : > { %v427_v46 = vor.u32 %v426_v44, %v379_v43  ;;  %v402_v26 = vsel %vm2038_vm6, 0, %v2014_v38  ;;  %v398_v18 = vsel %vm2038_vm6, 0, %v2016_v39 }
  0x36   : > { %507 = vrot.lane.b32.xlu0 %v449_v31, %s1738_s23  ;;  %v450_v47 = vsel %vm1938_vm3, %v427_v46, 0 }
  0x37   : > { %469 = vrot.lane.b32.xlu1 %v1956_v48, %s1737_s9  ;;  %v381_v48 = vrot.slane %v379_v43, 7 }
  0x39   : > { %v2035_v49 = vor.u32 %v382_v36, %v381_v48 }
  0x3a   : > { %497 = vrot.lane.b32.xlu0 %v444_v40, %s1738_s23 }
  0x3b   : > { %499 = vrot.lane.b32.xlu1 %v445_v42, %s1738_s23  ;;  %v407_v31 = vsel %vm2038_vm6, 0, %v2035_v49 }
  0x3e   : > { %461 = vrot.lane.b32.xlu0 %v305_v20, %s1737_s9 }
  0x3f   : > { %491 = vrot.lane.b32.xlu1 %v441_v45, %s1738_s23 }
  0x42   : > { %479 = vrot.lane.b32.xlu0 %v314_v10, %s1737_s9  ;;  %s1397_s9 = sshll.u32 %s2469_s10, 1 }
  0x43   : > { %509 = vrot.lane.b32.xlu1 %v450_v47, %s1738_s23  ;;  %s2134_s12 = sadd.s32 %s1398_s13, %s1397_s9  ;;  %s1458_s23 = sshll.u32 %s1222_s11, 5 }
  0x44   : > { %s1399_s14 = sshll.u32 %s2134_s12, 2  ;;  %s233_s9 = scalar_lea.vmem [#allocation2], %s1393_s6 }
  0x45   : > { %s2144_s30 = scalar_lea.vmem %s2441_s2, %s1399_s14  ;;  %s1226_s13 = sshll.u32 %s233_s9, 4  ;;  %s1227_s13 = int_to_ptr.vmem [resolvable:$true] %s1226_s13 }
  0x46   : > { %s1649_s6 = scalar_lea.vmem %s1648_s27, 64  ;;  %p1650_p9 = scmp.lt.s32.totalorder %s1227_s13, %s1648_s27 }
  0x90   : > { %v472_v50 = vpop.permute.xlu0 %471 }
  0x91   : > { %v464_v51 = vpop.permute.xlu1 %463  ;;  %v529_v60 = vsel %vm511_vm7, %v403_v57, %v472_v50 }
  0x92   : > { %v517_v2 = vsel %vm511_vm7, %v399_v61, %v464_v51 }
  0x94   : > { %v474_v52 = vpop.permute.xlu0 %473 }
  0x95   : > { %v466_v53 = vpop.permute.xlu1 %465  ;;  %v532_v58 = vsel %vm511_vm7, %v404_v55, %v474_v52 }
  0x96   : > { %v520_v5 = vsel %vm511_vm7, %v400_v0, %v466_v53 }
  0x98   : > { %v476_v37 = vpop.permute.xlu0 %475 }
  0x99   : > { %v478_v56 = vpop.permute.xlu1 %477  ;;  %v535_v12 = vsel %vm511_vm7, %v405_v6, %v476_v37 }
  0x9a   : > { %v538_v20 = vsel %vm511_vm7, %v406_v16, %v478_v56 }
  0x9c   : > { %v504_v59 = vpop.permute.xlu0 %503 }
  0x9d   : > { %v556_v62 = vsel %vm542_vm8, %v532_v58, %v504_v59  ;;  %v502_v63 = vpop.permute.xlu1 %501 }
  0x9e   : > { %v554_v1 = vsel %vm542_vm8, %v529_v60, %v502_v63 }
  0x9f   : > { %1516 = vmatprep.mubr.msk.bf16.mxu1 %vm573_vm9, %v554_v1 }
  0xa0   : > { %1517 = vmatmul.mubr.msk.bf16.vlgmr.msra.gmra.mxu1 %vm573_vm9, %v556_v62  ;;  %v494_v3 = vpop.permute.xlu0 %493 }
  0xa1   : > { %v496_v7 = vpop.permute.xlu1 %495  ;;  %v546_v8 = vsel %vm542_vm8, %v517_v2, %v494_v3  ;;  %1525 = vmatpush3.bf16.msra.mxu1 %v699_v33 }
  0xa2   : > { %v548_v11 = vsel %vm542_vm8, %v520_v5, %v496_v7  ;;  %1508 = vmatprep.mubr.msk.bf16.mxu0 %vm573_vm9, %v546_v8 }
  0xa3   : > { %1509 = vmatmul.mubr.msk.bf16.vlgmr.msra.gmra.mxu0 %vm573_vm9, %v548_v11 }
  0xa4   : > { %v506_v15 = vpop.permute.xlu0 %505  ;;  %1543 = vmatpush3.bf16.msra.mxu0 %v809_v34 }
  0xa5   : > { %v468_v17 = vpop.permute.xlu1 %467  ;;  %v558_v19 = vsel %vm542_vm8, %v535_v12, %v506_v15 }
  0xa6   : > { %1520 = vmatprep.mubr.msk.bf16.mxu1 %vm573_vm9, %v558_v19  ;;  %v523_v4 = vsel %vm511_vm7, %v401_v22, %v468_v17 }
  0xa8   : > { %v508_v21 = vpop.permute.xlu0 %507 }
  0xa9   : > { %v470_v23 = vpop.permute.xlu1 %469  ;;  %v560_v25 = vsel %vm542_vm8, %v538_v20, %v508_v21 }
  0xaa   : > { %1521 = vmatmul.mubr.msk.bf16.gmra.mxu1 %vm573_vm9, %v560_v25  ;;  %v526_v14 = vsel %vm511_vm7, %v402_v26, %v470_v23 }
  0xac   : > { %v498_v9 = vpop.permute.xlu0 %497 }
  0xad   : > { %v500_v27 = vpop.permute.xlu1 %499  ;;  %v550_v28 = vsel %vm542_vm8, %v523_v4, %v498_v9 }
  0xae   : > { %v552_v10 = vsel %vm542_vm8, %v526_v14, %v500_v27  ;;  %1512 = vmatprep.mubr.msk.bf16.mxu0 %vm573_vm9, %v550_v28 }
  0xaf   : > { %1513 = vmatmul.mubr.msk.bf16.gmra.mxu0 %vm573_vm9, %v552_v10 }
  0xb0   : > { %1544 = vmatprep.mubr.msk.bf16.mxu0 %vm573_vm9, %v548_v11  ;;  %v462_v29 = vpop.permute.xlu0 %461 }
  0xb1   : > { %v514_v30 = vsel %vm511_vm7, %v398_v18, %v462_v29  ;;  %v492_v13 = vpop.permute.xlu1 %491 }
  0xb2   : > { %v544_v24 = vsel %vm542_vm8, %v514_v30, %v492_v13 }
  0xb3   : > { %1526 = vmatprep.mubr.msk.bf16.mxu1 %vm573_vm9, %v544_v24 }
  0xb4   : > { %1527 = vmatmul.mubr.msk.bf16.vlgmr.msra.gmra.mxu1 %vm573_vm9, %v546_v8  ;;  %v480_v32 = vpop.permute.xlu0 %479 }
  0xb5   : > { %1530 = vmatprep.mubr.msk.bf16.mxu1 %vm573_vm9, %v548_v11  ;;  %v541_v33 = vsel %vm511_vm7, %v407_v31, %v480_v32  ;;  %v510_v34 = vpop.permute.xlu1 %509 }
  0xb6   : > { %v562_v35 = vsel %vm542_vm8, %v541_v33, %v510_v34 }
  0xb7   : > { %1545 = vmatmul.mubr.msk.bf16.vlgmr.msra.gmra.mxu0 %vm573_vm9, %v550_v28 }
  0xb8   : > { %1548 = vmatprep.mubr.msk.bf16.mxu0 %vm573_vm9, %v552_v10 }
  0xbc   : > { %1531 = vmatmul.mubr.msk.bf16.gmra.mxu1 %vm573_vm9, %v550_v28 }
  0xbd   : > { %1534 = vmatprep.mubr.msk.bf16.mxu1 %vm573_vm9, %v552_v10 }
  0xbf   : > { %1549 = vmatmul.mubr.msk.bf16.gmra.mxu0 %vm573_vm9, %v554_v1 }
  0xc0   : > { %1552 = vmatprep.mubr.msk.bf16.mxu0 %vm573_vm9, %v556_v62 }
  0xc4   : > { %1535 = vmatmul.mubr.msk.bf16.gmra.mxu1 %vm573_vm9, %v554_v1 }
  0xc5   : > { %1538 = vmatprep.mubr.msk.bf16.mxu1 %vm573_vm9, %v556_v62 }
  0xc7   : > { %1553 = vmatmul.mubr.msk.bf16.gmra.mxu0 %vm573_vm9, %v558_v19 }
  0xc8   : > { %1556 = vmatprep.mubr.msk.bf16.mxu0 %vm573_vm9, %v560_v25 }
  0xcc   : > { %1539 = vmatmul.mubr.msk.bf16.gmra.mxu1 %vm573_vm9, %v558_v19 }
  0xcf   : > { %1557 = vmatmul.mubr.msk.bf16.gmra.mxu0 %vm573_vm9, %v562_v35 }
 0x160   : > { %v2115_v36 = vpop.f32.mrf.mxu1 }
 0x162   : > { %v2117_v38 = vpop.f32.mrf.mxu1 }
 0x163   : > { %v1510_v39 = vpop.f32.mrf.mxu0 }
 0x164   : > { %v2119_v40 = vpop.f32.mrf.mxu1 }
 0x165   : > { %v628_v42 = vpop.f32.mrf.mxu0 }
 0x166   : > { %v2121_v41 = vpop.f32.mrf.mxu1 }
 0x167   : > { %v1511_v43 = vpop.f32.mrf.mxu0 }
 0x169   : > { %v631_v46 = vpop.f32.mrf.mxu0 }
 0x16a   : > { %v2124_v44 = vpop.f32.mrf.mxu1 }
 0x16c   : > { %v2126_v45 = vpop.f32.mrf.mxu1 }
 0x16e   : > { %v2129_v47 = vpop.f32.mrf.mxu1 }
 0x16f   : > { %v1514_v48 = vpop.f32.mrf.mxu0 }
 0x170   : > { %v2132_v50 = vpop.f32.mrf.mxu1 }
 0x171   : > { %v644_v49 = vpop.f32.mrf.mxu0 }
 0x173   : > { %v1515_v51 = vpop.f32.mrf.mxu0 }
 0x174   : > { %v1528_v52 = vpop.f32.mrf.mxu1 }
 0x175   : > { %v744_v53 = vadd.f32 %v1528_v52, %v1510_v39  ;;  %v647_v54 = vpop.f32.mrf.mxu0 }
 0x176   : > { %v735_v37 = vpop.f32.mrf.mxu1 }
 0x177   : > { %v736_v55 = vadd.f32 %v735_v37, %v628_v42  ;;  %v1546_v56 = vpop.f32.mrf.mxu0 }
 0x178   : > { %v2137_v57 = vadd.f32 %v1546_v56, %v744_v53  ;;  %v1529_v58 = vpop.f32.mrf.mxu1 }
 0x179   : > { %v747_v59 = vadd.f32 %v1529_v58, %v1511_v43  ;;  %v845_v60 = vpop.f32.mrf.mxu0 }
 0x17a   : > { %v2146_v61 = vadd.f32 %v845_v60, %v736_v55  ;;  %v738_v62 = vpop.f32.mrf.mxu1  ;;  %v1465_v63 = vpack.c.bf16 %v2137_v57, %v2137_v57  ;;  %v928_v4 = vsel %vm924_vm11, %v2137_v57, 0.0 }
 0x17b   : > { %v739_v0 = vadd.f32 %v738_v62, %v631_v46  ;;  %v1547_v1 = vpop.f32.mrf.mxu0 }
 0x17c   : > { %v2150_v2 = vadd.f32 %v1547_v1, %v747_v59  ;;  %1120 = vrot.lane.b32.xlu0 %v1465_v63, %s1739_s5  ;;  %1102 = vst.msk [vmem:[%s2144_s30 + $0x8] sm:$0xf] %vm1099_vm10, %v1465_v63  ;;  %v1532_v3 = vpop.f32.mrf.mxu1  ;;  %v1463_v5 = vpack.c.bf16 %v2146_v61, %v2146_v61  ;;  %v925_v17 = vsel %vm924_vm11, %v2146_v61, 0.0 }
 0x17d   : > { %v760_v6 = vadd.f32 %v1532_v3, %v1514_v48  ;;  %v848_v7 = vpop.f32.mrf.mxu0 }
 0x17e   : > { %v2157_v8 = vadd.f32 %v848_v7, %v739_v0  ;;  %v751_v11 = vpop.f32.mrf.mxu1  ;;  %v1466_v12 = vpack.c.bf16 %v2150_v2, %v2150_v2  ;;  %1100 = vst.msk [vmem:[%s2144_s30] sm:$0xf] %vm1099_vm10, %v1463_v5  ;;  %v930_v29 = vsel %vm924_vm11, %v2150_v2, 0.0 }
 0x17f   : > { %v752_v15 = vadd.f32 %v751_v11, %v644_v49  ;;  %v1550_v16 = vpop.f32.mrf.mxu0 }
 0x180   : > { %v926_v19 = vsel %vm924_vm11, %v2157_v8, 0.0  ;;  %v2167_v20 = vadd.f32 %v1550_v16, %v760_v6  ;;  %1122 = vrot.lane.b32.xlu1 %v1466_v12, %s1739_s5  ;;  %1103 = vst.msk [vmem:[%s2144_s30 + $0xc] sm:$0xf] %vm1099_vm10, %v1466_v12  ;;  %v1533_v21 = vpop.f32.mrf.mxu1  ;;  %1116 = vrot.lane.b32.xlu0 %v1463_v5, %s1739_s5  ;;  %v1464_v22 = vpack.c.bf16 %v2157_v8, %v2157_v8 }
 0x181   : > { %v927_v23 = vadd.f32 %v926_v19, %v925_v17  ;;  %v763_v25 = vadd.f32 %v1533_v21, %v1515_v51  ;;  %v861_v26 = vpop.f32.mrf.mxu0 }
 0x182   : > { %v2177_v9 = vadd.f32 %v861_v26, %v752_v15  ;;  %v754_v14 = vpop.f32.mrf.mxu1  ;;  %1101 = vst.msk [vmem:[%s2144_s30 + $0x4] sm:$0xf] %vm1099_vm10, %v1464_v22  ;;  %v1469_v27 = vpack.c.bf16 %v2167_v20, %v2167_v20  ;;  %v936_v37 = vsel %vm924_vm11, %v2167_v20, 0.0 }
 0x183   : > { %v929_v28 = vadd.f32 %v928_v4, %v927_v23  ;;  %v755_v10 = vadd.f32 %v754_v14, %v647_v54  ;;  %v1551_v18 = vpop.f32.mrf.mxu0 }
 0x184   : > { %v2185_v30 = vadd.f32 %v1551_v18, %v763_v25  ;;  %v1536_v13 = vpop.f32.mrf.mxu1  ;;  %1118 = vrot.lane.b32.xlu1 %v1464_v22, %s1739_s5  ;;  %1106 = vst.msk [vmem:[%s2144_s30 + $0x18] sm:$0xf] %vm1099_vm10, %v1469_v27  ;;  %1128 = vrot.lane.b32.xlu0 %v1469_v27, %s1739_s5  ;;  %v1467_v24 = vpack.c.bf16 %v2177_v9, %v2177_v9  ;;  %v932_v34 = vsel %vm924_vm11, %v2177_v9, 0.0 }
 0x185   : > { %v931_v31 = vadd.f32 %v930_v29, %v929_v28  ;;  %v776_v32 = vadd.f32 %v1536_v13, %v2115_v36  ;;  %v864_v33 = vpop.f32.mrf.mxu0 }
 0x186   : > { %v2196_v35 = vadd.f32 %v864_v33, %v755_v10  ;;  %v767_v39 = vpop.f32.mrf.mxu1  ;;  %v1470_v42 = vpack.c.bf16 %v2185_v30, %v2185_v30  ;;  %1104 = vst.msk [vmem:[%s2144_s30 + $0x10] sm:$0xf] %vm1099_vm10, %v1467_v24 }
 0x187   : > { %v933_v43 = vadd.f32 %v932_v34, %v931_v31  ;;  %v768_v46 = vadd.f32 %v767_v39, %v2117_v38  ;;  %v1554_v48 = vpop.f32.mrf.mxu0 }
 0x188   : > { %v934_v36 = vsel %vm924_vm11, %v2196_v35, 0.0  ;;  %v2205_v49 = vadd.f32 %v1554_v48, %v776_v32  ;;  %v1537_v51 = vpop.f32.mrf.mxu1  ;;  %1107 = vst.msk [vmem:[%s2144_s30 + $0x1c] sm:$0xf] %vm1099_vm10, %v1470_v42  ;;  %1130 = vrot.lane.b32.xlu1 %v1470_v42, %s1739_s5  ;;  %1124 = vrot.lane.b32.xlu0 %v1467_v24, %s1739_s5  ;;  %v1468_v52 = vpack.c.bf16 %v2196_v35, %v2196_v35 }
 0x189   : > { %v935_v53 = vadd.f32 %v934_v36, %v933_v43  ;;  %v779_v38 = vadd.f32 %v1537_v51, %v2119_v40  ;;  %v877_v54 = vpop.f32.mrf.mxu0  ;;  %v938_v40 = vsel %vm924_vm11, %v2185_v30, 0.0 }
 0x18a   : > { %v2216_v55 = vadd.f32 %v877_v54, %v768_v46  ;;  %v770_v56 = vpop.f32.mrf.mxu1  ;;  %1105 = vst.msk [vmem:[%s2144_s30 + $0x14] sm:$0xf] %vm1099_vm10, %v1468_v52  ;;  %v1473_v58 = vpack.c.bf16 %v2205_v49, %v2205_v49  ;;  %v944_v26 = vsel %vm924_vm11, %v2205_v49, 0.0 }
 0x18b   : > { %v937_v59 = vadd.f32 %v936_v37, %v935_v53  ;;  %v771_v60 = vadd.f32 %v770_v56, %v2121_v41  ;;  %v1555_v62 = vpop.f32.mrf.mxu0 }
 0x18c   : > { %v2225_v63 = vadd.f32 %v1555_v62, %v779_v38  ;;  %v1540_v0 = vpop.f32.mrf.mxu1  ;;  %1126 = vrot.lane.b32.xlu1 %v1468_v52, %s1739_s5  ;;  %1110 = vst.msk [vmem:[%s2144_s30 + $0x28] sm:$0xf] %vm1099_vm10, %v1473_v58  ;;  %1136 = vrot.lane.b32.xlu0 %v1473_v58, %s1739_s5  ;;  %v1471_v1 = vpack.c.bf16 %v2216_v55, %v2216_v55  ;;  %v940_v6 = vsel %vm924_vm11, %v2216_v55, 0.0 }
 0x18d   : > { %v939_v3 = vadd.f32 %v938_v40, %v937_v59  ;;  %v792_v41 = vadd.f32 %v1540_v0, %v2124_v44  ;;  %v880_v5 = vpop.f32.mrf.mxu0 }
 0x18e   : > { %v2236_v7 = vadd.f32 %v880_v5, %v771_v60  ;;  %v783_v11 = vpop.f32.mrf.mxu1  ;;  %v1474_v12 = vpack.c.bf16 %v2225_v63, %v2225_v63  ;;  %1108 = vst.msk [vmem:[%s2144_s30 + $0x20] sm:$0xf] %vm1099_vm10, %v1471_v1 }
 0x18f   : > { %v941_v15 = vadd.f32 %v940_v6, %v939_v3  ;;  %v784_v16 = vadd.f32 %v783_v11, %v2126_v45  ;;  %v1558_v17 = vpop.f32.mrf.mxu0 }
 0x190   : > { %v942_v44 = vsel %vm924_vm11, %v2236_v7, 0.0  ;;  %v2245_v19 = vadd.f32 %v1558_v17, %v792_v41  ;;  %v1541_v21 = vpop.f32.mrf.mxu1  ;;  %1111 = vst.msk [vmem:[%s2144_s30 + $0x2c] sm:$0xf] %vm1099_vm10, %v1474_v12  ;;  %1138 = vrot.lane.b32.xlu1 %v1474_v12, %s1739_s5  ;;  %1132 = vrot.lane.b32.xlu0 %v1471_v1, %s1739_s5  ;;  %v1472_v22 = vpack.c.bf16 %v2236_v7, %v2236_v7 }
 0x191   : > { %v943_v23 = vadd.f32 %v942_v44, %v941_v15  ;;  %v795_v45 = vadd.f32 %v1541_v21, %v2129_v47  ;;  %v893_v25 = vpop.f32.mrf.mxu0  ;;  %v946_v47 = vsel %vm924_vm11, %v2225_v63, 0.0 }
 0x192   : > { %v2256_v4 = vadd.f32 %v893_v25, %v784_v16  ;;  %v786_v14 = vpop.f32.mrf.mxu1  ;;  %1109 = vst.msk [vmem:[%s2144_s30 + $0x24] sm:$0xf] %vm1099_vm10, %v1472_v22  ;;  %v1477_v27 = vpack.c.bf16 %v2245_v19, %v2245_v19  ;;  %v952_v46 = vsel %vm924_vm11, %v2245_v19, 0.0 }
 0x193   : > { %v945_v28 = vadd.f32 %v944_v26, %v943_v23  ;;  %v787_v10 = vadd.f32 %v786_v14, %v2132_v50  ;;  %v1559_v18 = vpop.f32.mrf.mxu0 }
 0x194   : > { %v2265_v29 = vadd.f32 %v1559_v18, %v795_v45  ;;  %1134 = vrot.lane.b32.xlu1 %v1472_v22, %s1739_s5  ;;  %v1475_v13 = vpack.c.bf16 %v2256_v4, %v2256_v4  ;;  %1114 = vst.msk [vmem:[%s2144_s30 + $0x38] sm:$0xf] %vm1099_vm10, %v1477_v27  ;;  %v948_v50 = vsel %vm924_vm11, %v2256_v4, 0.0 }
 0x195   : > { %v947_v24 = vadd.f32 %v946_v47, %v945_v28  ;;  %v896_v31 = vpop.f32.mrf.mxu0 }
 0x196   : > { %v2274_v32 = vadd.f32 %v896_v31, %v787_v10  ;;  %1112 = vst.msk [vmem:[%s2144_s30 + $0x30] sm:$0xf] %vm1099_vm10, %v1475_v13  ;;  %1140 = vrot.lane.b32.xlu0 %v1475_v13, %s1739_s5  ;;  %v1478_v33 = vpack.c.bf16 %v2265_v29, %v2265_v29  ;;  %v954_v36 = vsel %vm924_vm11, %v2265_v29, 0.0 }
 0x197   : > { %v949_v34 = vadd.f32 %v948_v50, %v947_v24 }
 0x198   : > { %v950_v39 = vsel %vm924_vm11, %v2274_v32, 0.0  ;;  %v1476_v42 = vpack.c.bf16 %v2274_v32, %v2274_v32  ;;  %1115 = vst.msk [vmem:[%s2144_s30 + $0x3c] sm:$0xf] %vm1099_vm10, %v1478_v33 }
 0x199   : > { %v951_v43 = vadd.f32 %v950_v39, %v949_v34 }
 0x19a   : > { %1113 = vst.msk [vmem:[%s2144_s30 + $0x34] sm:$0xf] %vm1099_vm10, %v1476_v42  ;;  %1142 = vrot.lane.b32.xlu1 %v1476_v42, %s1739_s5  ;;  %1144 = vrot.lane.b32.xlu0 %v1477_v27, %s1739_s5  ;;  %s2352_s30 = scalar_lea.hbm %s2443_s4, %s1458_s23 }
 0x19b   : > { %v953_v48 = vadd.f32 %v952_v46, %v951_v43 }
 0x19d   : > { %v955_v51 = vadd.f32 %v954_v36, %v953_v48 }
 0x19e   : > { %1146 = vrot.lane.b32.xlu1 %v1478_v33, %s1739_s5  ;;  %s1643_s5 = scalar_lea.vmem %s1227_s13, 32 }
 0x19f   : > { %v956_v52 = vrot.slane %v955_v51, 4  ;;  %p1644_p5 = scmp.ne.s32.totalorder %s1227_s13, %s1643_s5  ;;  %p1651_p10 = scmp.lt.s32.totalorder %s1649_s6, %s1643_s5 }
 0x1a1   : > { %v957_v53 = vadd.f32 %v956_v52, %v955_v51  ;;  %p1645_p6 = pnand %p1644_p5, %p1817_p3  ;;  %p1652_p11 = por %p1651_p10, %p1650_p9 }
 0x1a3   : > { %v958_v38 = vrot.slane %v957_v53, 2  ;;  %p1646_p7 = pneg %p1645_p6 }
 0x1a5   : > { %v959_v54 = vadd.f32 %v958_v38, %v957_v53  ;;  %p1653_p12 = pnand %p1652_p11, %p1646_p7 }
 0x1a7   : > { %v960_v37 = vrot.slane %v959_v54, 1 }
 0x1a9   : > { %v961_v56 = vadd.f32 %v960_v37, %v959_v54 }
 0x1ab   : > { %v2296_v58 = vmul.f32 0.0078125, %v961_v56 }
 0x1ad   : > { %v964_v59 = vsub.f32 %v2146_v61, %v2296_v58  ;;  %v965_v60 = vsub.f32 %v2157_v8, %v2296_v58  ;;  %v966_v62 = vsub.f32 %v2137_v57, %v2296_v58  ;;  %v967_v40 = vsub.f32 %v2150_v2, %v2296_v58 }
 0x1ae   : > { %v968_v3 = vsub.f32 %v2177_v9, %v2296_v58  ;;  %v969_v5 = vsub.f32 %v2196_v35, %v2296_v58  ;;  %v970_v57 = vsub.f32 %v2167_v20, %v2296_v58  ;;  %v971_v9 = vsub.f32 %v2185_v30, %v2296_v58 }
 0x1af   : > { %v980_v0 = vmul.f32 %v964_v59, %v964_v59  ;;  %v981_v1 = vmul.f32 %v965_v60, %v965_v60  ;;  %v982_v41 = vmul.f32 %v966_v62, %v966_v62  ;;  %v983_v6 = vmul.f32 %v967_v40, %v967_v40 }
 0x1b0   : > { %v984_v12 = vmul.f32 %v968_v3, %v968_v3  ;;  %v985_v16 = vmul.f32 %v969_v5, %v969_v5  ;;  %v972_v44 = vsub.f32 %v2216_v55, %v2296_v58  ;;  %v986_v21 = vmul.f32 %v970_v57, %v970_v57 }
 0x1b1   : > { %v996_v61 = vsel %vm924_vm11, %v980_v0, 0.0  ;;  %v997_v8 = vsel %vm924_vm11, %v981_v1, 0.0  ;;  %v999_v2 = vsel %vm924_vm11, %v982_v41, 0.0  ;;  %v1001_v17 = vsel %vm924_vm11, %v983_v6, 0.0 }
 0x1b2   : > { %v998_v11 = vadd.f32 %v997_v8, %v996_v61  ;;  %v1003_v22 = vsel %vm924_vm11, %v984_v12, 0.0  ;;  %v973_v20 = vsub.f32 %v2236_v7, %v2296_v58  ;;  %v987_v45 = vmul.f32 %v971_v9, %v971_v9 }
 0x1b3   : > { %v1005_v25 = vsel %vm924_vm11, %v985_v16, 0.0  ;;  %v974_v30 = vsub.f32 %v2205_v49, %v2296_v58  ;;  %v988_v14 = vmul.f32 %v972_v44, %v972_v44  ;;  %v1007_v27 = vsel %vm924_vm11, %v986_v21, 0.0 }
 0x1b4   : > { %v1000_v15 = vadd.f32 %v999_v2, %v998_v11  ;;  %v975_v55 = vsub.f32 %v2225_v63, %v2296_v58  ;;  %v989_v10 = vmul.f32 %v973_v20, %v973_v20  ;;  %v1009_v18 = vsel %vm924_vm11, %v987_v45, 0.0 }
 0x1b5   : > { %v976_v7 = vsub.f32 %v2256_v4, %v2296_v58  ;;  %v990_v13 = vmul.f32 %v974_v30, %v974_v30  ;;  %v1011_v24 = vsel %vm924_vm11, %v988_v14, 0.0  ;;  %v977_v49 = vsub.f32 %v2274_v32, %v2296_v58 }
 0x1b6   : > { %v1002_v35 = vadd.f32 %v1001_v17, %v1000_v15  ;;  %v991_v50 = vmul.f32 %v975_v55, %v975_v55  ;;  %v1013_v33 = vsel %vm924_vm11, %v989_v10, 0.0  ;;  %v978_v63 = vsub.f32 %v2245_v19, %v2296_v58 }
 0x1b7   : > { %v992_v39 = vmul.f32 %v976_v7, %v976_v7  ;;  %v1015_v42 = vsel %vm924_vm11, %v990_v13, 0.0  ;;  %v979_v4 = vsub.f32 %v2265_v29, %v2296_v58  ;;  %v993_v46 = vmul.f32 %v977_v49, %v977_v49 }
 0x1b8   : > { %v1004_v23 = vadd.f32 %v1003_v22, %v1002_v35  ;;  %v1017_v48 = vsel %vm924_vm11, %v991_v50, 0.0  ;;  %v994_v36 = vmul.f32 %v978_v63, %v978_v63 }
 0x1b9   : > { %v1019_v51 = vsel %vm924_vm11, %v992_v39, 0.0  ;;  %v995_v53 = vmul.f32 %v979_v4, %v979_v4  ;;  %v1021_v19 = vsel %vm924_vm11, %v993_v46, 0.0 }
 0x1ba   : > { %v1006_v26 = vadd.f32 %v1005_v25, %v1004_v23  ;;  %v1023_v54 = vsel %vm924_vm11, %v994_v36, 0.0 }
 0x1bb   : > { %v1025_v56 = vsel %vm924_vm11, %v995_v53, 0.0 }
 0x1bc   : > { %v1008_v28 = vadd.f32 %v1007_v27, %v1006_v26 }
 0x1be   : > { %v1010_v47 = vadd.f32 %v1009_v18, %v1008_v28 }
 0x1c0   : > { %v1012_v31 = vadd.f32 %v1011_v24, %v1010_v47 }
 0x1c2   : > { %v1014_v34 = vadd.f32 %v1013_v33, %v1012_v31 }
 0x1c4   : > { %v1016_v43 = vadd.f32 %v1015_v42, %v1014_v34 }
 0x1c6   : > { %v1018_v32 = vadd.f32 %v1017_v48, %v1016_v43 }
 0x1c8   : > { %v1020_v52 = vadd.f32 %v1019_v51, %v1018_v32 }
 0x1ca   : > { %v1022_v38 = vadd.f32 %v1021_v19, %v1020_v52 }
 0x1cc   : > { %v1024_v37 = vadd.f32 %v1023_v54, %v1022_v38 }
 0x1ce   : > { %v1026_v29 = vadd.f32 %v1025_v56, %v1024_v37 }
 0x1d0   : > { %v1027_v59 = vrot.slane %v1026_v29, 4 }
 0x1d2   : > { %v1028_v60 = vadd.f32 %v1027_v59, %v1026_v29 }
 0x1d4   : > { %v1029_v62 = vrot.slane %v1028_v60, 2 }
 0x1d6   : > { %v1030_v40 = vadd.f32 %v1029_v62, %v1028_v60 }
 0x1d8   : > { %v1031_v0 = vrot.slane %v1030_v40, 1 }
 0x1da   : > { %v1032_v1 = vadd.f32 %v1031_v0, %v1030_v40 }
 0x1dc   : > { %v1034_v3 = vsel %vm395_vm4, %v2296_v58, %v1032_v1 }
 0x1dd   : > { %1181 = vst.msk [vmem:[%s233_s9] sm:$0x3] %vm1180_vm12, %v1034_v3 }
 0x1de   : > { %1656 = shalt.err (!%p1653_p12)
}
 0x1df   : > { %s1657_s11 = scalar_lea.hbm %s2352_s30, 32  ;;  %s1661_s9 = scalar_lea.hbm %s2443_s4, 128 }
 0x1e0   : > { %p1658_p13 = scmp.ne.s32.totalorder %s2352_s30, %s1657_s11  ;;  %p1662_p2 = scmp.lt.s32.totalorder %s2352_s30, %s2443_s4 }
 0x1e1   : > { %p1663_p4 = scmp.lt.s32.totalorder %s1661_s9, %s1657_s11 }
 0x1e2   : > { %p1659_p0 = pnand %p1658_p13, %p1817_p3 }
 0x1e3   : > { %p1664_p5 = por %p1663_p4, %p1662_p2 }
 0x1e4   : > { %p1660_p1 = pneg %p1659_p0 }
 0x1e6   : > { %p1665_p6 = pnand %p1664_p5, %p1660_p1 }
 0x1e8   : > { %1668 = shalt.err (!%p1665_p6)
}
 0x1e9   : > { %1566 = dma.vmem_to_hbm [thread:$0]  (%p1817_p3), %s1227_s13, 32, %s2352_s30, %s1203_s19  }
 0x1ea   : > { %s2377_s27 = scalar_lea.vmem %s2442_s3, %s1399_s14 }
 0x1ee   : > { %v1121_v58 = vpop.permute.xlu0 %1120 }
 0x1ef   : > { %1166 = vst.msk [vmem:[%s2377_s27 + $0x8] sm:$0xf] %vm1099_vm10, %v1121_v58 }
 0x1f2   : > { %v1123_v41 = vpop.permute.xlu1 %1122  ;;  %v1117_v5 = vpop.permute.xlu0 %1116 }
 0x1f3   : > { %1167 = vst.msk [vmem:[%s2377_s27 + $0xc] sm:$0xf] %vm1099_vm10, %v1123_v41  ;;  %1164 = vst.msk [vmem:[%s2377_s27] sm:$0xf] %vm1099_vm10, %v1117_v5 }
 0x1f6   : > { %v1119_v6 = vpop.permute.xlu1 %1118  ;;  %v1129_v61 = vpop.permute.xlu0 %1128 }
 0x1f7   : > { %1165 = vst.msk [vmem:[%s2377_s27 + $0x4] sm:$0xf] %vm1099_vm10, %v1119_v6  ;;  %1170 = vst.msk [vmem:[%s2377_s27 + $0x18] sm:$0xf] %vm1099_vm10, %v1129_v61 }
 0x1fa   : > { %v1131_v8 = vpop.permute.xlu1 %1130  ;;  %v1125_v11 = vpop.permute.xlu0 %1124 }
 0x1fb   : > { %1171 = vst.msk [vmem:[%s2377_s27 + $0x1c] sm:$0xf] %vm1099_vm10, %v1131_v8  ;;  %1168 = vst.msk [vmem:[%s2377_s27 + $0x10] sm:$0xf] %vm1099_vm10, %v1125_v11 }
 0x1fe   : > { %v1127_v57 = vpop.permute.xlu1 %1126  ;;  %v1137_v12 = vpop.permute.xlu0 %1136 }
 0x1ff   : > { %1169 = vst.msk [vmem:[%s2377_s27 + $0x14] sm:$0xf] %vm1099_vm10, %v1127_v57  ;;  %1174 = vst.msk [vmem:[%s2377_s27 + $0x28] sm:$0xf] %vm1099_vm10, %v1137_v12 }
 0x202   : > { %v1139_v2 = vpop.permute.xlu1 %1138  ;;  %v1133_v15 = vpop.permute.xlu0 %1132 }
 0x203   : > { %1175 = vst.msk [vmem:[%s2377_s27 + $0x2c] sm:$0xf] %vm1099_vm10, %v1139_v2  ;;  %1172 = vst.msk [vmem:[%s2377_s27 + $0x20] sm:$0xf] %vm1099_vm10, %v1133_v15 }
 0x206   : > { %v1135_v9 = vpop.permute.xlu1 %1134 }
 0x207   : > { %1173 = vst.msk [vmem:[%s2377_s27 + $0x24] sm:$0xf] %vm1099_vm10, %v1135_v9 }
 0x208   : > { %v1141_v16 = vpop.permute.xlu0 %1140 }
 0x209   : > { %1176 = vst.msk [vmem:[%s2377_s27 + $0x30] sm:$0xf] %vm1099_vm10, %v1141_v16 }
 0x20c   : > { %v1143_v17 = vpop.permute.xlu1 %1142  ;;  %v1145_v35 = vpop.permute.xlu0 %1144 }
 0x20d   : > { %1177 = vst.msk [vmem:[%s2377_s27 + $0x34] sm:$0xf] %vm1099_vm10, %v1143_v17  ;;  %1178 = vst.msk [vmem:[%s2377_s27 + $0x38] sm:$0xf] %vm1099_vm10, %v1145_v35 }
 0x210   : > { %v1147_v44 = vpop.permute.xlu1 %1146 }
 0x211   : > { %1179 = vst.msk [vmem:[%s2377_s27 + $0x3c] sm:$0xf] %vm1099_vm10, %v1147_v44 }
 0x212 PF: > { %p1572_p3 = scmp.ge.s32.totalorder %s1735_s22, 2  ;;  %s1264_s28 = sand.u32 1, %s1707_s15  }
 0x213   : > { %s1265_s12 = scalar_lea.sflag [#allocation3], %s1264_s28 }
 0x214   : > { %p1569_p7 = pnand %p1572_p3, %p1826_p8 }
 0x216   : > { %p1570_p9 = pneg %p1569_p7 }
 0x218   : > { %1702 = dma.done.wait (%p1570_p9), %s1265_s12, 32  }
 0x219   : > { %1704 = vsyncadd (%p1570_p9), %s1265_s12, 4294967264  ;;  %s18_s22 = sadd.s32 1, %s1735_s22   ;;  %s2451_s15 = smov %s1711_s16 }
 0x21a   : > { %p15_p10 = scmp.ge.s32.totalorder %s18_s22, 6   ;;  %s2452_s16 = smov %s1715_s17 }
 0x21b   : > { %s2453_s17 = smov %s1835_s7  ;;  %s2454_s18 = smov %s1727_s20 }
 0x21c   : > { %s2455_s19 = smov %s1731_s21  ;;  %s2456_s20 = smov %s2459_s25 }
 0x21d   : > { %s2457_s21 = smov %s2463_s26  ;;  %17 = sbr.rel (!%p15_p10) target bundleno = 5 (0x5), region = 92 }
 0x222   :  { %1270 = vsyncpa [#allocation3], 1 }
 0x223   :  { %1272 = vsyncpa [#allocation3 + $0x1], 1 }

</bundles_post_ra>
